<compile_context>
chip_gen: v7x
topology: tpu7x:2x2x1
jax: 0.10.0
libtpu: 0.0.40
codegen_flags: <defaults>
</compile_context>

<pallas_src>
import functools

import jax
import jax.numpy as jnp
from jax import lax
from jax.experimental import pallas as pl
from jax.experimental.pallas import tpu as pltpu


def _simclr_row_loss_kernel(zq_ref, zk_ref, o_ref, m_sc, l_sc, pos_sc,
                            *, batch_tiles):
    i = pl.program_id(0)            # row (query) tile  -- "parallel"
    j = pl.program_id(1)            # col (key) tile    -- reduction, last axis
    nt = pl.num_programs(1)

    # Per-row-tile accumulator reset (queries/keys arrive pre-normalized and
    # the 1/temperature scale is already folded into the query copy in HBM).
    @pl.when(j == 0)
    def _init():
        m_sc[...] = jnp.full_like(m_sc, -1e30)
        l_sc[...] = jnp.zeros_like(l_sc)
        pos_sc[...] = jnp.zeros_like(pos_sc)

    q = zq_ref[...]                 # (T, D) mm_dtype, unit rows * 1/temperature
    k = zk_ref[...]                 # (T, D) mm_dtype, unit rows

    # Similarity tile: contract last dims directly -- no transpose feeding MXU.
    s = lax.dot_general(q, k, dimension_numbers=(((1,), (1,)), ((), ())),
                        preferred_element_type=jnp.float32)

    def _accumulate(logits):
        # Online logsumexp over column tiles (all f32; -1e30 masked entries
        # underflow exactly to 0 in the exp -- do not move this to bf16).
        m_prev = m_sc[...]
        m_new = jnp.maximum(m_prev, jnp.max(logits, axis=-1, keepdims=True))
        alpha = jnp.exp(m_prev - m_new)
        l_sc[...] = alpha * l_sc[...] + jnp.sum(jnp.exp(logits - m_new),
                                                axis=-1, keepdims=True)
        m_sc[...] = m_new

    # Diagonal-mask construction is gated: only the j == i tile contains the
    # self-similarity diagonal, so off-diagonal steps pay zero VPU cost here.
    @pl.when(j == i)
    def _diag_tile():
        tm, tn = s.shape
        rloc = lax.broadcasted_iota(jnp.int32, (tm, tn), 0)
        cloc = lax.broadcasted_iota(jnp.int32, (tm, tn), 1)
        _accumulate(jnp.where(rloc == cloc, jnp.float32(-1e30), s))

    @pl.when(j != i)
    def _offdiag_tile():
        _accumulate(s)

    # Positive pair: partner of global row r is row (r + B) mod N.  With the
    # tile size dividing B, all partners of this row tile sit in exactly one
    # column tile, locally aligned, so the positive logit is a row-wise dot of
    # the SAME mm_dtype-rounded operands the MXU consumed (f32 accumulation),
    # keeping it consistent with the logsumexp.
    partner_tile = (i + batch_tiles) % nt

    @pl.when(j == partner_tile)
    def _pos():
        pos_sc[...] = jnp.sum(q.astype(jnp.float32) * k.astype(jnp.float32),
                              axis=-1, keepdims=True)

    # Finalize: per-row cross entropy (labels all 0) = logsumexp - positive.
    @pl.when(j == nt - 1)
    def _done():
        o_ref[...] = m_sc[...] + jnp.log(l_sc[...]) - pos_sc[...]


def _pick_block_rows(batch_size, feat, in_bytes, vmem_limit_bytes=None):
    """VMEM-footprint-aware row-tile pick.

    Footprint per step ~ double-buffered query+key tile streams
    (2 streams * 2 buffers * T*D*in_bytes) + f32 T*T temporaries (similarity
    tile, mask, exp inputs/outputs) + tiny (T,1) scratches.  Default budget
    stays under the default scoped-VMEM limit on every generation
    (16 MiB on v5e, 32 MiB on v6e/v7x; v7x physical VMEM is 64 MiB).  Pass
    vmem_limit_bytes to unlock larger tiles on v6e/v7x.
    """
    budget = int(0.6 * vmem_limit_bytes) if vmem_limit_bytes else 12 * 1024 * 1024

    def footprint(t):
        tile_streams = 2 * 2 * t * feat * in_bytes   # q + k, double-buffered
        tt_temps = 4 * 4 * t * t                     # s / mask / exp temporaries
        small = 5 * 4 * t                            # (T,1) scratches + out block
        return tile_streams + tt_temps + small

    for cand in (1024, 512, 256, 128, 64, 32, 16, 8):
        if batch_size % cand == 0 and footprint(cand) <= budget:
            return cand
    raise ValueError(
        "batch_size must be a multiple of 8 and a tile must fit the VMEM "
        f"budget; got batch_size={batch_size}, feat={feat}")


def simclr_loss(z_i, z_j, *, temperature, block_rows=None,
                mm_dtype=jnp.bfloat16, vmem_limit_bytes=None,
                col_buffer_count=None, core_parallel_rows=False):
    """Pallas implementation of SimCLR_Loss.forward(z_i, z_j).

    mm_dtype: MXU operand dtype (bf16 default; pass jnp.float32 for exact).
    col_buffer_count: optional deeper prefetch (pl.Buffered) on the key-tile
        stream -- useful on HBM-bound v5e.
    core_parallel_rows: use pltpu.CORE_PARALLEL on the row axis for explicit
        2-TensorCore sharding on v7x.
    """
    assert z_i.shape == z_j.shape and z_i.ndim == 2
    batch_size, feat = z_i.shape
    n_rows = 2 * batch_size

    # One-time O(N*D) prep in XLA, fused with the concat: l2-normalize with
    # the reference clamp (1/max(||z||, 1e-8)), fold 1/temperature into the
    # query copy, and cast to the MXU operand dtype so the kernel's dominant
    # column-tile DMA stream is already in mm_dtype (half the bytes for bf16).
    z = jnp.concatenate([z_i, z_j], axis=0).astype(jnp.float32)
    inv_norm = lax.rsqrt(
        jnp.maximum(jnp.sum(z * z, axis=-1, keepdims=True), jnp.float32(1e-16)))
    zn = z * inv_norm
    z_k = zn.astype(mm_dtype)
    z_q = (zn * jnp.float32(1.0 / float(temperature))).astype(mm_dtype)

    in_bytes = jnp.dtype(mm_dtype).itemsize
    if block_rows is None:
        block_rows = _pick_block_rows(batch_size, feat, in_bytes,
                                      vmem_limit_bytes)
    assert batch_size % block_rows == 0 and block_rows % 8 == 0
    batch_tiles = batch_size // block_rows
    num_tiles = n_rows // block_rows

    kernel = functools.partial(_simclr_row_loss_kernel,
                               batch_tiles=batch_tiles)

    col_spec_kwargs = {}
    if col_buffer_count is not None:
        col_spec_kwargs["pipeline_mode"] = pl.Buffered(col_buffer_count)

    row_semantics = (pltpu.CORE_PARALLEL if core_parallel_rows else "parallel")

    row_losses = pl.pallas_call(
        kernel,
        out_shape=jax.ShapeDtypeStruct((n_rows, 1), jnp.float32),
        grid=(num_tiles, num_tiles),
        in_specs=[
            # Query rows: block index constant across j -> fetched once per
            # row tile by the pipeline.
            pl.BlockSpec((block_rows, feat), lambda i, j: (i, 0)),
            # Key rows: the dominant, pipelined DMA stream.
            pl.BlockSpec((block_rows, feat), lambda i, j: (j, 0),
                         **col_spec_kwargs),
        ],
        out_specs=pl.BlockSpec((block_rows, 1), lambda i, j: (i, 0)),
        scratch_shapes=[
            pltpu.VMEM((block_rows, 1), jnp.float32),   # running max
            pltpu.VMEM((block_rows, 1), jnp.float32),   # running sum
            pltpu.VMEM((block_rows, 1), jnp.float32),   # positive logits
        ],
        compiler_params=pltpu.CompilerParams(
            dimension_semantics=(row_semantics, "arbitrary"),
            vmem_limit_bytes=vmem_limit_bytes),
    )(z_q, z_k)

    return jnp.sum(row_losses) / jnp.float32(n_rows)


def _simclr_loss_ref(z_i, z_j, *, temperature):
    """Pure-JAX reference mirroring the PyTorch SimCLR loss, for sanity checks."""
    batch = z_i.shape[0]
    n_rows = 2 * batch
    z = jnp.concatenate([z_i, z_j], axis=0).astype(jnp.float32)
    norm = jnp.maximum(jnp.linalg.norm(z, axis=-1, keepdims=True), 1e-8)
    zn = z / norm
    sim = (zn @ zn.T) / temperature
    pos = jnp.concatenate(
        [jnp.diagonal(sim, offset=batch), jnp.diagonal(sim, offset=-batch)],
        axis=0)
    eye = jnp.eye(n_rows, dtype=bool)
    sim_no_diag = jnp.where(eye, -jnp.inf, sim)
    lse = jax.scipy.special.logsumexp(sim_no_diag, axis=-1)
    return jnp.sum(lse - pos) / n_rows


if __name__ == "__main__":
    batch_size = 8
    feat_dim = 32
    temperature = 0.5

    key = jax.random.PRNGKey(0)
    k1, k2 = jax.random.split(key)
    z_i = jax.random.normal(k1, (batch_size, feat_dim), dtype=jnp.float32)
    z_j = jax.random.normal(k2, (batch_size, feat_dim), dtype=jnp.float32)

    ref = _simclr_loss_ref(z_i, z_j, temperature=temperature)

    # Exact f32-operand path (opt-in).
    loss_f32 = jax.block_until_ready(
        simclr_loss(z_i, z_j, temperature=temperature, mm_dtype=jnp.float32))
    assert jnp.allclose(loss_f32, ref, rtol=1e-5, atol=1e-5), (loss_f32, ref)

    # Default fast path: bf16 MXU operands + bf16 HBM tiles; logsumexp/loss in f32.
    loss_bf16 = jax.block_until_ready(
        simclr_loss(z_i, z_j, temperature=temperature))
    assert jnp.allclose(loss_bf16, ref, rtol=5e-2, atol=5e-2), (loss_bf16, ref)

    print("KERNEL_OK")
</pallas_src>

<mosaic_0001>
module attributes {stable_mosaic.version = 11 : i64} {
  func.func @_simclr_row_loss_kernel(%arg0: i32, %arg1: i32, %arg2: memref<8x32xf32, #tpu.memory_space<vmem>>, %arg3: memref<8x32xf32, #tpu.memory_space<vmem>>, %arg4: memref<8x1xf32, #tpu.memory_space<vmem>>, %arg5: memref<8x1xf32, #tpu.memory_space<vmem>>, %arg6: memref<8x1xf32, #tpu.memory_space<vmem>>, %arg7: memref<8x1xf32, #tpu.memory_space<vmem>>) attributes {dimension_semantics = [#tpu.dimension_semantics<parallel>, #tpu.dimension_semantics<arbitrary>], iteration_bounds = array<i64: 2, 2>, scalar_prefetch = 0 : i64, scratch_operands = 3 : i64, tpu.core_type = #tpu.core_type<tc>, window_params = [{transform_indices = @transform_0, window_bounds = array<i64: 8, 32>}, {transform_indices = @transform_1, window_bounds = array<i64: 8, 32>}, {transform_indices = @transform_2, window_bounds = array<i64: 8, 1>}]} {
    %c0_i32 = arith.constant 0 : i32
    %0 = arith.cmpi eq, %arg1, %c0_i32 : i32
    %1 = arith.extui %0 : i1 to i32
    %c0_i32_0 = arith.constant 0 : i32
    %2 = arith.cmpi ne, %1, %c0_i32_0 : i32
    scf.if %2 {
      %cst_14 = arith.constant -1.000000e+30 : f32
      %29 = vector.broadcast %cst_14 : f32 to vector<8x1xf32>
      %c0_15 = arith.constant 0 : index
      %c0_16 = arith.constant 0 : index
      %30 = vector.load %arg5[%c0_15, %c0_16] : memref<8x1xf32, #tpu.memory_space<vmem>>, vector<8x1xf32>
      tpu.vector_store %arg5[%c0_15, %c0_16], %29 {strides = array<i32>} : memref<8x1xf32, #tpu.memory_space<vmem>>, vector<8x1xf32>,
      %cst_17 = arith.constant 0.000000e+00 : f32
      %31 = vector.broadcast %cst_17 : f32 to vector<8x1xf32>
      %c0_18 = arith.constant 0 : index
      %c0_19 = arith.constant 0 : index
      %32 = vector.load %arg6[%c0_18, %c0_19] : memref<8x1xf32, #tpu.memory_space<vmem>>, vector<8x1xf32>
      tpu.vector_store %arg6[%c0_18, %c0_19], %31 {strides = array<i32>} : memref<8x1xf32, #tpu.memory_space<vmem>>, vector<8x1xf32>,
      %cst_20 = arith.constant 0.000000e+00 : f32
      %33 = vector.broadcast %cst_20 : f32 to vector<8x1xf32>
      %c0_21 = arith.constant 0 : index
      %c0_22 = arith.constant 0 : index
      %34 = vector.load %arg7[%c0_21, %c0_22] : memref<8x1xf32, #tpu.memory_space<vmem>>, vector<8x1xf32>
      tpu.vector_store %arg7[%c0_21, %c0_22], %33 {strides = array<i32>} : memref<8x1xf32, #tpu.memory_space<vmem>>, vector<8x1xf32>,
    } else {
    }
    %c0 = arith.constant 0 : index
    %c0_1 = arith.constant 0 : index
    %3 = vector.load %arg2[%c0, %c0_1] : memref<8x32xf32, #tpu.memory_space<vmem>>, vector<8x32xf32>
    %c0_2 = arith.constant 0 : index
    %c0_3 = arith.constant 0 : index
    %4 = vector.load %arg3[%c0_2, %c0_3] : memref<8x32xf32, #tpu.memory_space<vmem>>, vector<8x32xf32>
    %cst = arith.constant dense<0.000000e+00> : vector<8x8xf32>
    %5 = tpu.matmul %3, %4, %cst {dimension_numbers = #tpu.dot_dimension_numbers<[1], [1], [0], [0], [0, 0, 1, 0], [], []>} : vector<8x32xf32>, vector<8x32xf32>, vector<8x8xf32> -> vector<8x8xf32>
    %6 = arith.cmpi eq, %arg1, %arg0 : i32
    %7 = arith.extui %6 : i1 to i32
    %c0_i32_4 = arith.constant 0 : i32
    %8 = arith.cmpi ne, %7, %c0_i32_4 : i32
    scf.if %8 {
      %29 = tpu.iota {dimensions = array<i32: 0>} : vector<8x8xi32>
      %30 = tpu.iota {dimensions = array<i32: 1>} : vector<8x8xi32>
      %31 = arith.cmpi eq, %29, %30 : vector<8x8xi32>
      %cst_14 = arith.constant -1.000000e+30 : f32
      %32 = vector.broadcast %cst_14 : f32 to vector<8x8xf32>
      %33 = arith.select %31, %32, %5 : vector<8x8xi1>, vector<8x8xf32>
      %c0_15 = arith.constant 0 : index
      %c0_16 = arith.constant 0 : index
      %34 = vector.load %arg5[%c0_15, %c0_16] : memref<8x1xf32, #tpu.memory_space<vmem>>, vector<8x1xf32>
      %cst_17 = arith.constant dense<0xFF800000> : vector<8xf32>
      %35 = vector.multi_reduction <maximumf>, %33, %cst_17 [1] : vector<8x8xf32> to vector<8xf32>
      %36 = vector.shape_cast %35 : vector<8xf32> to vector<8x1xf32>
      %37 = arith.maximumf %34, %36 : vector<8x1xf32>
      %38 = arith.subf %34, %37 : vector<8x1xf32>
      %39 = math.exp %38 : vector<8x1xf32>
      %c0_18 = arith.constant 0 : index
      %c0_19 = arith.constant 0 : index
      %40 = vector.load %arg6[%c0_18, %c0_19] : memref<8x1xf32, #tpu.memory_space<vmem>>, vector<8x1xf32>
      %41 = arith.mulf %39, %40 : vector<8x1xf32>
      %42 = vector.broadcast %37 : vector<8x1xf32> to vector<8x8xf32>
      %43 = arith.subf %33, %42 : vector<8x8xf32>
      %44 = math.exp %43 : vector<8x8xf32>
      %cst_20 = arith.constant dense<0.000000e+00> : vector<8xf32>
      %45 = vector.multi_reduction <add>, %44, %cst_20 [1] : vector<8x8xf32> to vector<8xf32>
      %46 = vector.shape_cast %45 : vector<8xf32> to vector<8x1xf32>
      %47 = arith.addf %41, %46 : vector<8x1xf32>
      %c0_21 = arith.constant 0 : index
      %c0_22 = arith.constant 0 : index
      %48 = vector.load %arg6[%c0_21, %c0_22] : memref<8x1xf32, #tpu.memory_space<vmem>>, vector<8x1xf32>
      tpu.vector_store %arg6[%c0_21, %c0_22], %47 {strides = array<i32>} : memref<8x1xf32, #tpu.memory_space<vmem>>, vector<8x1xf32>,
      %c0_23 = arith.constant 0 : index
      %c0_24 = arith.constant 0 : index
      %49 = vector.load %arg5[%c0_23, %c0_24] : memref<8x1xf32, #tpu.memory_space<vmem>>, vector<8x1xf32>
      tpu.vector_store %arg5[%c0_23, %c0_24], %37 {strides = array<i32>} : memref<8x1xf32, #tpu.memory_space<vmem>>, vector<8x1xf32>,
    } else {
    }
    %9 = arith.cmpi ne, %arg1, %arg0 : i32
    %10 = arith.extui %9 : i1 to i32
    %c0_i32_5 = arith.constant 0 : i32
    %11 = arith.cmpi ne, %10, %c0_i32_5 : i32
    scf.if %11 {
      %c0_14 = arith.constant 0 : index
      %c0_15 = arith.constant 0 : index
      %29 = vector.load %arg5[%c0_14, %c0_15] : memref<8x1xf32, #tpu.memory_space<vmem>>, vector<8x1xf32>
      %cst_16 = arith.constant dense<0xFF800000> : vector<8xf32>
      %30 = vector.multi_reduction <maximumf>, %5, %cst_16 [1] : vector<8x8xf32> to vector<8xf32>
      %31 = vector.shape_cast %30 : vector<8xf32> to vector<8x1xf32>
      %32 = arith.maximumf %29, %31 : vector<8x1xf32>
      %33 = arith.subf %29, %32 : vector<8x1xf32>
      %34 = math.exp %33 : vector<8x1xf32>
      %c0_17 = arith.constant 0 : index
      %c0_18 = arith.constant 0 : index
      %35 = vector.load %arg6[%c0_17, %c0_18] : memref<8x1xf32, #tpu.memory_space<vmem>>, vector<8x1xf32>
      %36 = arith.mulf %34, %35 : vector<8x1xf32>
      %37 = vector.broadcast %32 : vector<8x1xf32> to vector<8x8xf32>
      %38 = arith.subf %5, %37 : vector<8x8xf32>
      %39 = math.exp %38 : vector<8x8xf32>
      %cst_19 = arith.constant dense<0.000000e+00> : vector<8xf32>
      %40 = vector.multi_reduction <add>, %39, %cst_19 [1] : vector<8x8xf32> to vector<8xf32>
      %41 = vector.shape_cast %40 : vector<8xf32> to vector<8x1xf32>
      %42 = arith.addf %36, %41 : vector<8x1xf32>
      %c0_20 = arith.constant 0 : index
      %c0_21 = arith.constant 0 : index
      %43 = vector.load %arg6[%c0_20, %c0_21] : memref<8x1xf32, #tpu.memory_space<vmem>>, vector<8x1xf32>
      tpu.vector_store %arg6[%c0_20, %c0_21], %42 {strides = array<i32>} : memref<8x1xf32, #tpu.memory_space<vmem>>, vector<8x1xf32>,
      %c0_22 = arith.constant 0 : index
      %c0_23 = arith.constant 0 : index
      %44 = vector.load %arg5[%c0_22, %c0_23] : memref<8x1xf32, #tpu.memory_space<vmem>>, vector<8x1xf32>
      tpu.vector_store %arg5[%c0_22, %c0_23], %32 {strides = array<i32>} : memref<8x1xf32, #tpu.memory_space<vmem>>, vector<8x1xf32>,
    } else {
    }
    %c1_i32 = arith.constant 1 : i32
    %12 = arith.addi %arg0, %c1_i32 : i32
    %c2_i32 = arith.constant 2 : i32
    %c0_i32_6 = arith.constant 0 : i32
    %13 = arith.cmpi eq, %c2_i32, %c0_i32_6 : i32
    %c1_i32_7 = arith.constant 1 : i32
    %14 = arith.select %13, %c1_i32_7, %c2_i32 : i32
    %15 = arith.remsi %12, %14 : i32
    %c0_i32_8 = arith.constant 0 : i32
    %16 = arith.cmpi ne, %15, %c0_i32_8 : i32
    %c0_i32_9 = arith.constant 0 : i32
    %17 = arith.cmpi slt, %15, %c0_i32_9 : i32
    %c0_i32_10 = arith.constant 0 : i32
    %18 = arith.cmpi slt, %14, %c0_i32_10 : i32
    %19 = arith.xori %17, %18 : i1
    %20 = arith.andi %19, %16 : i1
    %21 = arith.addi %15, %14 : i32
    %22 = arith.select %20, %21, %15 : i32
    %23 = arith.cmpi eq, %arg1, %22 : i32
    %24 = arith.extui %23 : i1 to i32
    %c0_i32_11 = arith.constant 0 : i32
    %25 = arith.cmpi ne, %24, %c0_i32_11 : i32
    scf.if %25 {
      %29 = arith.mulf %3, %4 : vector<8x32xf32>
      %cst_14 = arith.constant dense<0.000000e+00> : vector<8xf32>
      %30 = vector.multi_reduction <add>, %29, %cst_14 [1] : vector<8x32xf32> to vector<8xf32>
      %31 = vector.shape_cast %30 : vector<8xf32> to vector<8x1xf32>
      %c0_15 = arith.constant 0 : index
      %c0_16 = arith.constant 0 : index
      %32 = vector.load %arg7[%c0_15, %c0_16] : memref<8x1xf32, #tpu.memory_space<vmem>>, vector<8x1xf32>
      tpu.vector_store %arg7[%c0_15, %c0_16], %31 {strides = array<i32>} : memref<8x1xf32, #tpu.memory_space<vmem>>, vector<8x1xf32>,
    } else {
    }
    %c1_i32_12 = arith.constant 1 : i32
    %26 = arith.cmpi eq, %arg1, %c1_i32_12 : i32
    %27 = arith.extui %26 : i1 to i32
    %c0_i32_13 = arith.constant 0 : i32
    %28 = arith.cmpi ne, %27, %c0_i32_13 : i32
    scf.if %28 {
      %c0_14 = arith.constant 0 : index
      %c0_15 = arith.constant 0 : index
      %29 = vector.load %arg5[%c0_14, %c0_15] : memref<8x1xf32, #tpu.memory_space<vmem>>, vector<8x1xf32>
      %c0_16 = arith.constant 0 : index
      %c0_17 = arith.constant 0 : index
      %30 = vector.load %arg6[%c0_16, %c0_17] : memref<8x1xf32, #tpu.memory_space<vmem>>, vector<8x1xf32>
      %31 = math.log %30 : vector<8x1xf32>
      %32 = arith.addf %29, %31 : vector<8x1xf32>
      %c0_18 = arith.constant 0 : index
      %c0_19 = arith.constant 0 : index
      %33 = vector.load %arg7[%c0_18, %c0_19] : memref<8x1xf32, #tpu.memory_space<vmem>>, vector<8x1xf32>
      %34 = arith.subf %32, %33 : vector<8x1xf32>
      %c0_20 = arith.constant 0 : index
      %c0_21 = arith.constant 0 : index
      %35 = vector.load %arg4[%c0_20, %c0_21] : memref<8x1xf32, #tpu.memory_space<vmem>>, vector<8x1xf32>
      tpu.vector_store %arg4[%c0_20, %c0_21], %34 {strides = array<i32>} : memref<8x1xf32, #tpu.memory_space<vmem>>, vector<8x1xf32>,
    } else {
    }
    return
  }
  func.func @transform_0(%arg0: i32, %arg1: i32) -> (i32, i32) {
    %c0_i32 = arith.constant 0 : i32
    %c0_i32_0 = arith.constant 0 : i32
    return %arg0, %c0_i32 : i32, i32
  }
  func.func @transform_1(%arg0: i32, %arg1: i32) -> (i32, i32) {
    %c0_i32 = arith.constant 0 : i32
    %c0_i32_0 = arith.constant 0 : i32
    return %arg1, %c0_i32 : i32, i32
  }
  func.func @transform_2(%arg0: i32, %arg1: i32) -> (i32, i32) {
    %c0_i32 = arith.constant 0 : i32
    %c0_i32_0 = arith.constant 0 : i32
    return %arg0, %c0_i32 : i32, i32
  }
}

</mosaic_0001>

<bundles_post_ra>
// kernel: tpu_custom_call.1
= control target key start
LH: loop header
LB: loop body
LE: loop exit
PB: predicated region body
PF: predicated region fallthrough
CT: control target
= control target key end

     0   :  { %7 = vsyncpa [#allocation6], 0  ;;  %s1107_s0 = inlined_call_operand.hbm [shape: f32[16,32], index: 0, kind: input, shape index: {}]   ;;  %s1108_s1 = inlined_call_operand.hbm [shape: f32[16,32], index: 1, kind: input, shape index: {}]   ;;  %s1109_s2 = inlined_call_operand.vmem [shape: f32[16,1], index: 2, kind: output, shape index: {}]  }
   0x1   :  { %9 = vsyncpa [#allocation6 + $0x1], 0 }
   0x2   :  { %10 = vsyncpa [#allocation8], 0 }
   0x3   :  { %12 = vsyncpa [#allocation8 + $0x1], 0  ;;  %s824_s9 = smov 0   ;;  %s826_s10 = smov 0  }
   0x4   :  { %s828_s11 = smov 0   ;;  %s830_s12 = smov 0  }
   0x5   :  { %s832_s13 = smov 0   ;;  %s834_s14 = smov 0  }
   0x6   :  { %s836_s15 = smov 0   ;;  %s838_s16 = smov 0  }
   0x7   :  { %s840_s17 = smov 0   ;;  %s842_s18 = smov 0  }
   0x8   :  { %s844_s19 = smov 0  }
   0x9 LB: > { %s496_s20 = sadd.s32 4294967295, %s799_s19   ;;  %s30_s21 = sadd.s32 1, %s795_s18  ;;  %s799_s19 = sphi %s844_s19, %s18_s19   ;;  %s795_s18 = sphi %s842_s18, %s1136_s18   ;;  %s791_s17 = sphi %s840_s17, %s1135_s17   ;;  %s787_s16 = sphi %s838_s16, %s1134_s16   ;;  %s783_s15 = sphi %s836_s15, %s1133_s15   ;;  %s779_s14 = sphi %s834_s14, %s1132_s14   ;;  %s775_s13 = sphi %s832_s13, %s1131_s13   ;;  %s771_s12 = sphi %s830_s12, %s1130_s12   ;;  %s767_s11 = sphi %s828_s11, %s1129_s11   ;;  %s763_s10 = sphi %s826_s10, %s1128_s10   ;;  %s759_s9 = sphi %s824_s9, %s1127_s9  }
   0xa   : > { %p44_p0 = scmp.ne.s32.totalorder %s779_s14, %s775_s13  ;;  %p1111_p1 = scmp.eq.s32.totalorder %s799_s19, 0 }
   0xb   : > { %p50_p2 = scmp.ne.s32.totalorder %s775_s13, %s771_s12  ;;  %p883_p3 = scmp.eq.s32.totalorder %s496_s20, 0 }
   0xc   : > { %p46_p4 = por %p1111_p1, %p44_p0  ;;  %p1110_p5 = scmp.lt.s32.totalorder %s799_s19, 4 }
   0xd   : > { %p892_p6 = por %p883_p3, %p50_p2  ;;  %s126_s24 = sand.u32 1, %s779_s14  }
   0xe   : > { %s500_s25 = sshll.u32 %s126_s24, 3  ;;  %s501_s26 = sshll.u32 %s795_s18, 7 }
   0xf   : > { %s1115_s23 = scalar_select %p892_p6, 1, 0 }
  0x10   : > { %s901_s29 = scalar_lea.hbm %s1107_s0, %s501_s26  ;;  %s130_s30 = scalar_lea.vmem [#allocation5], %s500_s25 }
  0x11   : > { %s137_s3 = sshll.u32 %s130_s30, 4  ;;  %p907_p7 = pnand %p1110_p5, %p46_p4  ;;  %s903_s3 = int_to_ptr.vmem [resolvable:$true] %s137_s3 }
  0x12   : > { %s127_s5 = scalar_lea.sflag [#allocation6], %s126_s24  ;;  %s645_s6 = scalar_lea.hbm %s901_s29, 128 }
  0x13   : > { %p646_p10 = scmp.ne.s32.totalorder %s901_s29, %s645_s6  ;;  %p647_p11 = pneg %p907_p7 }
  0x14   : > { %s650_s12 = scalar_lea.hbm %s1107_s0, 256  ;;  %p651_p0 = scmp.lt.u32.totalorder %s901_s29, %s1107_s0 }
  0x15   : > { %p648_p12 = pnand %p647_p11, %p646_p10  ;;  %p652_p2 = scmp.lt.u32.totalorder %s650_s12, %s645_s6 }
  0x16   : > { %p654_p5 = scmp.lt.u32.totalorder %s645_s6, %s901_s29 }
  0x17   : > { %p649_p13 = pneg %p648_p12  ;;  %p653_p4 = por %p652_p2, %p651_p0 }
  0x19   : > { %p655_p1 = por %p654_p5, %p653_p4 }
  0x1b   : > { %p656_p8 = pnand %p655_p1, %p649_p13 }
  0x1d   : > { %659 = shalt.err (!%p656_p8)
}
  0x1e   : > { %s660_s24 = scalar_lea.vmem %s903_s3, 128  ;;  %s801_s26 = smov [#allocation5]  }
  0x1f   : > { %p661_p10 = scmp.ne.s32.totalorder %s903_s3, %s660_s24  ;;  %s665_s27 = sshll.u32 %s801_s26, 4  ;;  %s666_s27 = int_to_ptr.vmem [resolvable:$false] %s665_s27 }
  0x20   : > { %s667_s28 = scalar_lea.vmem %s666_s27, 256  ;;  %p668_p6 = scmp.lt.s32.totalorder %s903_s3, %s666_s27 }
  0x21   : > { %p663_p12 = pnand %p661_p10, %p647_p11  ;;  %p669_p0 = scmp.lt.s32.totalorder %s667_s28, %s660_s24 }
  0x23   : > { %p664_p9 = pneg %p663_p12  ;;  %p670_p2 = por %p669_p0, %p668_p6 }
  0x25   : > { %p671_p5 = pnand %p670_p2, %p664_p9 }
  0x27   : > { %674 = shalt.err (!%p671_p5)
}
  0x28   : > { %534 = dma.hbm_to_vmem [thread:$0]  (!%p907_p7), %s901_s29, 128, %s903_s3, %s127_s5  }
  0x29   : > { %p1117_p1 = scmp.lt.s32.totalorder %s799_s19, 5  ;;  %p1118_p6 = scmp.ge.s32.totalorder %s799_s19, 1 }
  0x2a   : > { %s37_s4 = sadd.s32 1, %s779_s14  ;;  %s27_s6 = sadd.s32 1, %s791_s17 }
  0x2b   : > { %p942_p8 = pnand %p1118_p6, %p1117_p1  ;;  %p28_p9 = scmp.ge.s32.totalorder %s27_s6, 2 }
  0x2c   : > { %s63_s7 = sadd.s32 1, %s767_s11  ;;  %p70_p11 = scmp.ne.s32.totalorder %s767_s11, %s763_s10 }
  0x2d   : > { %p76_p13 = scmp.ne.s32.totalorder %s763_s10, %s759_s9  ;;  %s1138_s6 = smov (%p28_p9, %s27_s6), 0 }
  0x2e   : > { %s1140_s21 = smov (!%p28_p9, %s30_s21), %s795_s18  ;;  %s60_s29 = ssub.s32 %s791_s17, %s1138_s6 }
  0x2f   : > { %s144_s3 = sand.u32 1, %s767_s11   ;;  %p32_p7 = scmp.ge.s32.totalorder %s1140_s21, 2 }
  0x30   : > { %p61_p4 = scmp.eq.s32.totalorder %s60_s29, 0  ;;  %p1120_p10 = scmp.eq.s32.totalorder %s799_s19, 0 }
  0x31   : > { %p969_p0 = por %p76_p13, %p883_p3  ;;  %s1142_s21 = smov (%p32_p7, %s1140_s21), 0 }
  0x32   : > { %p963_p12 = por %p70_p11, %p1120_p10  ;;  %s34_s12 = ssub.s32 %s795_s18, %s1142_s21 }
  0x33   : > { %s1122_s9 = scalar_select %p969_p0, 1, 0 }
  0x34   : > { %s976_s8 = scalar_select %p61_p4, %s767_s11, %s63_s7  }
  0x35   : > { %s502_s20 = sshll.u32 %s144_s3, 3  ;;  %p35_p2 = scmp.eq.s32.totalorder %s34_s12, 0 }
  0x36   : > { %s503_s25 = sshll.u32 %s791_s17, 7  ;;  %s148_s24 = scalar_lea.vmem [#allocation7], %s502_s20 }
  0x37   : > { %s155_s26 = sshll.u32 %s148_s24, 4  ;;  %s987_s29 = scalar_lea.hbm %s1108_s1, %s503_s25  ;;  %s989_s26 = int_to_ptr.vmem [resolvable:$true] %s155_s26 }
  0x38   : > { %s982_s27 = scalar_select %p35_p2, %s779_s14, %s37_s4  }
  0x39   : > { %p1123_p3 = scmp.lt.s32.totalorder %s799_s19, 4  ;;  %s145_s4 = scalar_lea.sflag [#allocation8], %s144_s3 }
  0x3a   : > { %s675_s12 = scalar_lea.hbm %s987_s29, 128  ;;  %s680_s5 = scalar_lea.hbm %s1108_s1, 256 }
  0x3b   : > { %p995_p5 = pnand %p1123_p3, %p963_p12  ;;  %p676_p1 = scmp.ne.s32.totalorder %s987_s29, %s675_s12 }
  0x3c   : > { %p681_p13 = scmp.lt.u32.totalorder %s987_s29, %s1108_s1  ;;  %p682_p7 = scmp.lt.u32.totalorder %s680_s5, %s675_s12 }
  0x3d   : > { %p677_p6 = pneg %p995_p5  ;;  %p684_p10 = scmp.lt.u32.totalorder %s675_s12, %s987_s29 }
  0x3e   : > { %p683_p4 = por %p682_p7, %p681_p13 }
  0x3f   : > { %p678_p9 = pnand %p677_p6, %p676_p1 }
  0x40   : > { %p685_p12 = por %p684_p10, %p683_p4 }
  0x41   : > { %p679_p11 = pneg %p678_p9 }
  0x43   : > { %p686_p2 = pnand %p685_p12, %p679_p11 }
  0x45   : > { %689 = shalt.err (!%p686_p2)
}
  0x46   : > { %s690_s3 = scalar_lea.vmem %s989_s26, 128  ;;  %s802_s22 = smov [#allocation7]  }
  0x47   : > { %p691_p3 = scmp.ne.s32.totalorder %s989_s26, %s690_s3  ;;  %s695_s20 = sshll.u32 %s802_s22, 4  ;;  %s696_s20 = int_to_ptr.vmem [resolvable:$false] %s695_s20 }
  0x48   : > { %s697_s25 = scalar_lea.vmem %s696_s20, 256  ;;  %p698_p0 = scmp.lt.s32.totalorder %s989_s26, %s696_s20 }
  0x49   : > { %p693_p1 = pnand %p691_p3, %p677_p6  ;;  %p699_p13 = scmp.lt.s32.totalorder %s697_s25, %s690_s3 }
  0x4b   : > { %p694_p9 = pneg %p693_p1  ;;  %p700_p7 = por %p699_p13, %p698_p0 }
  0x4d   : > { %p701_p4 = pnand %p700_p7, %p694_p9 }
  0x4f   : > { %704 = shalt.err (!%p701_p4)
}
  0x50   : > { %537 = dma.hbm_to_vmem [thread:$0]  (!%p995_p5), %s987_s29, 128, %s989_s26, %s145_s4  }
  0x51   : > { %164 = sbr.rel (%p942_p8) target bundleno = 1367 (0x557), region = 28  ;;  %s166_s12 = sand.u32 (!%p942_p8), 1, %s775_s13  }
  0x52   : > { %s1027_s5 = sshll.u32 (!%p942_p8), %s166_s12, 3  ;;  %s167_s24 = scalar_lea.sflag (!%p942_p8), [#allocation6], %s166_s12 }
  0x53   : > { %s170_s28 = scalar_lea.vmem (!%p942_p8), [#allocation5], %s1027_s5  ;;  %p1125_p6 = scmp.ne.s32.totalorder (!%p942_p8), %s1115_s23, 0 }
  0x58   : > { %750 = dma.done.wait (%p1125_p6), %s167_s24, 128  }
  0x59   : > { %752 = vsyncadd (%p1125_p6), %s167_s24, 4294967168  ;;  %s175_s7 = sand.u32 1, %s763_s10   ;;  %p1126_p8 = scmp.ne.s32.totalorder %s1122_s9, 0 }
  0x5a   : > { %s506_s26 = sshll.u32 %s175_s7, 3  ;;  %s176_s29 = scalar_lea.sflag [#allocation8], %s175_s7 }
  0x5b   : > { %s179_s30 = scalar_lea.vmem [#allocation7], %s506_s26 }
  0x5c   : > { %754 = dma.done.wait (%p1126_p8), %s176_s29, 128  }
  0x5d   : > { %756 = vsyncadd (%p1126_p8), %s176_s29, 4294967168  ;;  %p204_p0 = scmp.lt.s32.totalorder %s787_s16, 1  ;;  %p508_p5 = scmp.ne.s32.totalorder %s783_s15, 0 }
  0x5e   : > { %vm212_vm0 = vcmask (!%p508_p5), 7168   ;;  %v803_v0 = vmov (!%p508_p5), -1e+30   ;;  %v804_v1 = vmov (!%p508_p5), 0.0  }
  0x5f   : > { %s205_s4 = scalar_select %p204_p0, %s787_s16, 1 }
  0x60   : > { %211 = sbr.rel (%p508_p5) target bundleno = 103 (0x67), region = 40  ;;  %213 = vst.msk [vmem:[#allocation2] sm:$0xff] (!%p508_p5), %vm212_vm0, %v803_v0  ;;  %214 = vst.msk [vmem:[#allocation3] sm:$0xff] (!%p508_p5), %vm212_vm0, %v804_v1 }
  0x61   : > { %s507_s3 = sshll.u32 %s205_s4, 3  ;;  %215 = vst.msk [vmem:[#allocation4] sm:$0xff] (!%p508_p5), %vm212_vm0, %v804_v1 }
  0x62   : > { %s1044_s23 = scalar_lea.vmem %s1109_s2, %s507_s3 }
  0x67 PF: > { %v1047_v2 = vld [vmem:[%s179_s30] sm:$0xff]  ;;  %vm218_vm1 = vcmask 261120   ;;  %v805_v3 = vmov 0.0   ;;  %vm806_vm2 = vmmov 0   ;;  %v1051_v4 = vld [vmem:[%s170_s28] sm:$0xff]  ;;  %p511_p11 = scmp.ne.s32.totalorder %s783_s15, %s787_s16 }
  0x68   : > { %522 = vmatprep.subr.mxu0 %v805_v3  ;;  %524 = vmatprep.mubr.msk.f32.mxu0 %vm806_vm2, %v805_v3  ;;  %v299_v7 = vlaneseq (!%p511_p11)  ;;  %vm306_vm3 = vcmask (!%p511_p11), 64512   ;;  %v807_v12 = vmov (!%p511_p11), 0   ;;  %v305_v13 = vld [vmem:[#allocation2] sm:$0xff] (!%p511_p11)  ;;  %vm328_vm5 = vcmask (!%p511_p11), 7168   ;;  %v314_v24 = vld [vmem:[#allocation3] sm:$0xff] (!%p511_p11) }
  0x69   : > { %523 = vmatpush3.xpose.msk.msra.mxu0 %vm218_vm1, %v1047_v2  ;;  %633 = vset.pattern.permute.xlu0 (!%p511_p11), %v807_v12 }
  0x6a   : > { %v300_v8 = vshrl.u32 (!%p511_p11), %v299_v7, 7  ;;  %v302_v9 = vand.u32 (!%p511_p11), 127, %v299_v7 }
  0x6c   : > { %525 = vmatmul.mubr.msk.f32.vlgmr.msra.gmra.mrb[0].mxu0 %vm218_vm1, %v1051_v4  ;;  %vm303_vm4 = vcmp.eq.s32.totalorder (!%p511_p11), %v300_v8, %v302_v9 }
 0x13a   : > { %298 = sbr.rel (%p511_p11) target bundleno = 755 (0x2f3), region = 44 }
 0x13f   : > { %v291_v5 = vpop.f32.mrb[0].mxu0 }
 0x140   : > { %v526_v6 = vpop.f32.mrb[1].mxu0  ;;  %v304_v10 = vsel (!%p511_p11), %vm303_vm4, -1e+30, %v291_v5 }
 0x141   : > { %v307_v11 = vsel %vm306_vm3, %v304_v10, -inf }
 0x142   : > { %308 = vmax.xlane.f32.xlu0 %v307_v11 }
 0x1cf   : > { %v309_v14 = vpop.xlane.xlu0 %308 }
 0x1d0   : > { %v310_v15 = vmax.f32 %v305_v13, %v309_v14 }
 0x1d2   : > { %v311_v16 = vsub.f32 %v305_v13, %v310_v15  ;;  %330 = vst.msk [vmem:[#allocation2] sm:$0xff] %vm328_vm5, %v310_v15  ;;  %318 = vperm.xlu0 %633, %v310_v15  }
 0x1d4   : > { %v312_v22 = vmul.f32 1.442695, %v311_v16 }
 0x251   : > { %v319_v17 = vpop.permute.xlu0 %318 }
 0x252   : > { %v321_v18 = vsub.f32 %v304_v10, %v319_v17 }
 0x254   : > { %v322_v19 = vmul.f32 1.442695, %v321_v18 }
 0x256   : > { %634 = vpow2.f32 %v322_v19 }
 0x257   : > { %636 = vpow2.f32 %v312_v22 }
 0x260   : > { %v635_v20 = vpop.eup %634 }
 0x261   : > { %v324_v21 = vsel %vm306_vm3, %v635_v20, 0.0  ;;  %v637_v23 = vpop.eup %636 }
 0x262   : > { %325 = vadd.xlane.f32.xlu1 %v324_v21  ;;  %v315_v25 = vmul.f32 %v637_v23, %v314_v24 }
 0x2ef   : > { %v326_v26 = vpop.xlane.xlu1 %325 }
 0x2f0   : > { %v327_v27 = vadd.f32 %v326_v26, %v315_v25 }
 0x2f2   : > { %329 = vst.msk [vmem:[#allocation3] sm:$0xff] %vm328_vm5, %v327_v27 }
 0x2f3 PF: > { %p512_p10 = scmp.eq.s32.totalorder %s783_s15, %s787_s16 }
 0x2f4   : > { %vm336_vm6 = vcmask (!%p512_p10), 64512   ;;  %v808_v29 = vmov (!%p512_p10), 0   ;;  %v335_v30 = vld [vmem:[#allocation2] sm:$0xff] (!%p512_p10)  ;;  %vm358_vm7 = vcmask (!%p512_p10), 7168  }
 0x2f5   : > { %334 = sbr.rel (%p512_p10) target bundleno = 1191 (0x4a7), region = 48  ;;  %v337_v28 = vsel (!%p512_p10), %vm336_vm6, %v291_v5, -inf  ;;  %638 = vset.pattern.permute.xlu0 (!%p512_p10), %v808_v29 }
 0x2f6   : > { %338 = vmax.xlane.f32.xlu0 (!%p512_p10), %v337_v28 }
 0x2f9   : > { %v344_v41 = vld [vmem:[#allocation3] sm:$0xff] (!%p512_p10) }
 0x383   : > { %v339_v31 = vpop.xlane.xlu0 %338 }
 0x384   : > { %v340_v32 = vmax.f32 %v335_v30, %v339_v31 }
 0x386   : > { %v341_v33 = vsub.f32 %v335_v30, %v340_v32  ;;  %360 = vst.msk [vmem:[#allocation2] sm:$0xff] %vm358_vm7, %v340_v32  ;;  %348 = vperm.xlu0 %638, %v340_v32  }
 0x388   : > { %v342_v39 = vmul.f32 1.442695, %v341_v33 }
 0x405   : > { %v349_v34 = vpop.permute.xlu0 %348 }
 0x406   : > { %v351_v35 = vsub.f32 %v291_v5, %v349_v34 }
 0x408   : > { %v352_v36 = vmul.f32 1.442695, %v351_v35 }
 0x40a   : > { %639 = vpow2.f32 %v352_v36 }
 0x40b   : > { %641 = vpow2.f32 %v342_v39 }
 0x414   : > { %v640_v37 = vpop.eup %639 }
 0x415   : > { %v354_v38 = vsel %vm336_vm6, %v640_v37, 0.0  ;;  %v642_v40 = vpop.eup %641 }
 0x416   : > { %355 = vadd.xlane.f32.xlu1 %v354_v38  ;;  %v345_v42 = vmul.f32 %v642_v40, %v344_v41 }
 0x4a3   : > { %v356_v43 = vpop.xlane.xlu1 %355 }
 0x4a4   : > { %v357_v44 = vadd.f32 %v356_v43, %v345_v42 }
 0x4a6   : > { %359 = vst.msk [vmem:[#allocation3] sm:$0xff] %vm358_vm7, %v357_v44 }
 0x4a7 PF: > { %s361_s9 = sadd.s32 1, %s787_s16 }
 0x4a8   : > { %p362_p12 = scmp.lt.s32.totalorder %s361_s9, 0  ;;  %s363_s25 = ssub.s32 0, %s361_s9 }
 0x4a9   : > { %s513_s12 = smin.u32 %s363_s25, %s361_s9 }
 0x4aa   : > { %s365_s5 = sand.u32 1, %s513_s12  }
 0x4ab   : > { %s366_s24 = ssub.s32 0, %s365_s5 }
 0x4ac   : > { %s1144_s24 = smov (!%p362_p12, %s366_s24), %s365_s5 }
 0x4ad   : > { %p515_p2 = scmp.lt.s32.totalorder %s1144_s24, 0  ;;  %s372_s28 = sadd.s32 2, %s1144_s24 }
 0x4af   : > { %s1146_s28 = smov (!%p515_p2, %s372_s28), %s1144_s24 }
 0x4b0   : > { %p516_p3 = scmp.ne.s32.totalorder %s783_s15, %s1146_s28 }
 0x4b1   : > { %v378_v45 = vmul.f32 (!%p516_p3), %v1047_v2, %v1051_v4  ;;  %vm382_vm8 = vcmask (!%p516_p3), 7168  }
 0x4b2   : > { %377 = sbr.rel (%p516_p3) target bundleno = 1347 (0x543), region = 52 }
 0x4b3   : > { %v379_v46 = vsel (!%p516_p3), %vm218_vm1, %v378_v45, 0.0 }
 0x4b4   : > { %380 = vadd.xlane.f32.xlu0 (!%p516_p3), %v379_v46 }
 0x541   : > { %v381_v47 = vpop.xlane.xlu0 %380 }
 0x542   : > { %383 = vst.msk [vmem:[#allocation4] sm:$0xff] %vm382_vm8, %v381_v47 }
 0x543 PF: > { %p517_p1 = scmp.ne.s32.totalorder %s783_s15, 1 }
 0x544   : > { %v389_v48 = vld [vmem:[#allocation3] sm:$0xff] (!%p517_p1)  ;;  %v388_v50 = vld [vmem:[#allocation2] sm:$0xff] (!%p517_p1)  ;;  %vm395_vm9 = vcmask (!%p517_p1), 7168  }
 0x545   : > { %387 = sbr.rel (%p517_p1) target bundleno = 1367 (0x557), region = 56  ;;  %643 = vlog2.f32 (!%p517_p1), %v389_v48 }
 0x549   : > { %v393_v52 = vld [vmem:[#allocation4] sm:$0xff] (!%p517_p1) }
 0x54f   : > { %v644_v49 = vpop.eup %643 }
 0x550   : > { %v391_v51 = vmul.f32 0.6931472, %v644_v49 }
 0x552   : > { %v392_v53 = vadd.f32 %v391_v51, %v388_v50 }
 0x554   : > { %v394_v54 = vsub.f32 %v392_v53, %v393_v52 }
 0x556   : > { %396 = vst.msk [vmem:[%s1044_s23] sm:$0xff] %vm395_vm9, %v394_v54 }
 0x557 PF: > { %s18_s19 = sadd.s32 1, %s799_s19   ;;  %s1127_s9 = smov %s763_s10 }
 0x558   : > { %p15_p9 = scmp.ge.s32.totalorder %s18_s19, 6   ;;  %s1128_s10 = smov %s767_s11 }
 0x559   : > { %s1129_s11 = smov %s976_s8  ;;  %s1130_s12 = smov %s775_s13 }
 0x55a   : > { %s1131_s13 = smov %s779_s14  ;;  %s1132_s14 = smov %s982_s27 }
 0x55b   : > { %s1133_s15 = smov %s791_s17  ;;  %s1134_s16 = smov %s795_s18 }
 0x55c   : > { %s1135_s17 = smov %s1138_s6  ;;  %s1136_s18 = smov %s1142_s21 }
 0x55d   :  { %17 = sbr.rel (!%p15_p9) target bundleno = 9 (0x9), region = 101 }
 0x564   :  { %416 = vsyncpa [#allocation6], 1 }
 0x565   :  { %418 = vsyncpa [#allocation6 + $0x1], 1 }
 0x566   :  { %419 = vsyncpa [#allocation8], 1 }
 0x567   :  { %421 = vsyncpa [#allocation8 + $0x1], 1 }

</bundles_post_ra>
